<compile_context>
chip_gen: v5e
topology: v5e:2x2
jax: 0.10.0
libtpu: 0.0.40
codegen_flags: <defaults>
</compile_context>

<pallas_src>
from math import sqrt

import jax
import jax.numpy as jnp
import numpy as np
from jax.experimental import pallas as pl
from jax.experimental.pallas import tpu as pltpu


# ---------------------------------------------------------------------------
# Helpers
# ---------------------------------------------------------------------------
def _round_up(x, m):
    return ((x + m - 1) // m) * m


def _pad_to(a, target, axis):
    pad = target - a.shape[axis]
    if pad == 0:
        return a
    widths = [(0, 0)] * a.ndim
    widths[axis] = (0, pad)
    return jnp.pad(a, widths)


# ---------------------------------------------------------------------------
# Kernels
# ---------------------------------------------------------------------------
def _matmul_kernel_2d(x_ref, w_ref, o_ref):
    # Whole K reduction fits in one tile: single dot, direct store (no accumulator RMW).
    o_ref[...] = jnp.dot(
        x_ref[...], w_ref[...], preferred_element_type=jnp.float32
    ).astype(o_ref.dtype)


def _matmul_kernel_3d(x_ref, w_ref, o_ref, acc_ref):
    # K is a trailing "arbitrary" reduction axis with a resident f32 accumulator tile.
    @pl.when(pl.program_id(2) == 0)
    def _init():
        acc_ref[...] = jnp.zeros_like(acc_ref)

    acc_ref[...] += jnp.dot(x_ref[...], w_ref[...],
                            preferred_element_type=jnp.float32)

    @pl.when(pl.program_id(2) == pl.num_programs(2) - 1)
    def _store():
        o_ref[...] = acc_ref[...].astype(o_ref.dtype)


# ---------------------------------------------------------------------------
# Weight preparation (eval-mode; constant per call site, cache / hoist this)
# ---------------------------------------------------------------------------
def prepare_mp_weight(weight, eps=1e-4, dtype=jnp.bfloat16):
    """l2norm rows (norm clamped at eps), divide by sqrt(fan_in), cast, transpose -> (K, N)."""
    dim_out, dim_in = weight.shape
    w32 = weight.astype(jnp.float32)
    nrm = jnp.sqrt(jnp.sum(w32 * w32, axis=-1, keepdims=True))
    w_n = w32 / jnp.maximum(nrm, eps) / sqrt(dim_in)
    # Cast BEFORE the transpose: the transpose HBM copy moves bf16, not f32.
    return jnp.transpose(w_n.astype(dtype), (1, 0))


# ---------------------------------------------------------------------------
# Wrapper
# ---------------------------------------------------------------------------
def mp_linear(x, weight, eps=1e-4, *, tm=256, tn=512, tk=512,
              max_collapsed_k=2048, out_dtype=None, prepared_weight=None):
    """x: (..., dim_in); weight: (dim_out, dim_in).  Returns (..., dim_out)."""
    dim_out, dim_in = weight.shape
    lead = x.shape[:-1]
    M = int(np.prod(lead)) if lead else 1
    K, N = dim_in, dim_out
    out_dtype = x.dtype if out_dtype is None else out_dtype
    out_bytes = jnp.dtype(out_dtype).itemsize

    w_t = prepared_weight if prepared_weight is not None else prepare_mp_weight(weight, eps)
    x2 = x.reshape(M, K).astype(jnp.bfloat16)

    # ---- adaptive tile sizes: large by default, but never over-pad small dims ----
    tm = min(tm, _round_up(M, 16))          # sublane-aligned, keeps >=2 M blocks for M>=512
    tn = min(tn, _round_up(N, 256))         # 256-multiple (full MXU fill on v6e/v7x)
    kp_min = _round_up(K, 128)
    collapse_k = kp_min <= max_collapsed_k
    tk = kp_min if collapse_k else min(tk, kp_min)

    Mp = _round_up(M, tm)
    Np = _round_up(N, tn)
    Kp = _round_up(K, tk)

    # Zero-pad (K padding is required for correctness; M/N padding is minimal & sliced off).
    x_p = _pad_to(_pad_to(x2, Mp, 0), Kp, 1)
    w_p = _pad_to(_pad_to(w_t, Kp, 0), Np, 1)

    cost = pl.CostEstimate(
        flops=2 * Mp * Kp * Np,
        bytes_accessed=(Mp * Kp + Kp * Np) * 2 + Mp * Np * out_bytes,
        transcendentals=0,
    )

    # Double-buffered inputs + output + f32 accumulator, with 2x headroom; clamp to
    # [32 MiB, 64 MiB] so it is valid on every generation (v7x has only 64 MiB/TC).
    vmem_est = 2 * (tm * tk * 2 + tk * tn * 2 + tm * tn * out_bytes) + tm * tn * 4
    vmem_limit = int(min(64 * 1024 * 1024, max(32 * 1024 * 1024, 2 * vmem_est)))

    if collapse_k:
        grid = (Mp // tm, Np // tn)
        out_p = pl.pallas_call(
            _matmul_kernel_2d,
            out_shape=jax.ShapeDtypeStruct((Mp, Np), out_dtype),
            grid_spec=pltpu.PrefetchScalarGridSpec(
                num_scalar_prefetch=0,
                grid=grid,
                in_specs=[
                    pl.BlockSpec((tm, Kp), lambda i, j: (i, 0)),
                    pl.BlockSpec((Kp, tn), lambda i, j: (0, j)),
                ],
                out_specs=pl.BlockSpec((tm, tn), lambda i, j: (i, j)),
            ),
            compiler_params=pltpu.CompilerParams(
                dimension_semantics=("parallel", "parallel"),
                vmem_limit_bytes=vmem_limit,
            ),
            cost_estimate=cost,
        )(x_p, w_p)
    else:
        grid = (Mp // tm, Np // tn, Kp // tk)
        out_p = pl.pallas_call(
            _matmul_kernel_3d,
            out_shape=jax.ShapeDtypeStruct((Mp, Np), out_dtype),
            grid_spec=pltpu.PrefetchScalarGridSpec(
                num_scalar_prefetch=0,
                grid=grid,
                in_specs=[
                    pl.BlockSpec((tm, tk), lambda i, j, k: (i, k)),
                    pl.BlockSpec((tk, tn), lambda i, j, k: (k, j)),
                ],
                out_specs=pl.BlockSpec((tm, tn), lambda i, j, k: (i, j)),
                scratch_shapes=[pltpu.VMEM((tm, tn), jnp.float32)],
            ),
            compiler_params=pltpu.CompilerParams(
                dimension_semantics=("parallel", "parallel", "arbitrary"),
                vmem_limit_bytes=vmem_limit,
            ),
            cost_estimate=cost,
        )(x_p, w_p)

    out = out_p[:M, :N]
    return out.reshape(*lead, N)


# ---------------------------------------------------------------------------
# Pure NumPy float64 reference (mirrors the PyTorch eval forward exactly)
# ---------------------------------------------------------------------------
def reference_np(x, weight, eps=1e-4):
    x = np.asarray(x, np.float64)
    w = np.asarray(weight, np.float64)
    n = np.sqrt((w * w).sum(-1, keepdims=True))
    wn = w / np.maximum(n, eps) / np.sqrt(w.shape[1])
    return x @ wn.T


if __name__ == "__main__":
    B, S, DIM_IN, DIM_OUT = 2, 256, 256, 256
    key = jax.random.PRNGKey(0)
    kx, kw = jax.random.split(key)
    x = jax.random.normal(kx, (B, S, DIM_IN), jnp.float32)
    weight = jax.random.normal(kw, (DIM_OUT, DIM_IN), jnp.float32)

    out = jax.jit(mp_linear)(x, weight)
    out = jax.block_until_ready(out)

    ref = reference_np(np.asarray(x), np.asarray(weight))
    # bf16 MXU operands with f32 accumulation -> relaxed tolerance vs float64 reference.
    # Callers needing f32-parity should pass f32 operands / a 3-pass variant instead.
    np.testing.assert_allclose(np.asarray(out), ref, rtol=2e-2, atol=5e-3)
    # TODO(synk): training-mode in-place weight re-normalization (self.weight.copy_)
    # is a training-only side effect and is intentionally not modeled.
    print("KERNEL_OK")
</pallas_src>

<mosaic_0001>
module attributes {stable_mosaic.version = 11 : i64} {
  func.func @_matmul_kernel_2d(%arg0: i32, %arg1: i32, %arg2: memref<256x256xbf16, #tpu.memory_space<vmem>>, %arg3: memref<256x256xbf16, #tpu.memory_space<vmem>>, %arg4: memref<256x256xf32, #tpu.memory_space<vmem>>) attributes {dimension_semantics = [#tpu.dimension_semantics<parallel>, #tpu.dimension_semantics<parallel>], iteration_bounds = array<i64: 2, 1>, scalar_prefetch = 0 : i64, scratch_operands = 0 : i64, tpu.core_type = #tpu.core_type<tc>, window_params = [{transform_indices = @transform_0, window_bounds = array<i64: 256, 256>}, {transform_indices = @transform_1, window_bounds = array<i64: 256, 256>}, {transform_indices = @transform_2, window_bounds = array<i64: 256, 256>}]} {
    %c0 = arith.constant 0 : index
    %c0_0 = arith.constant 0 : index
    %0 = vector.load %arg2[%c0, %c0_0] : memref<256x256xbf16, #tpu.memory_space<vmem>>, vector<256x256xbf16>
    %c0_1 = arith.constant 0 : index
    %c0_2 = arith.constant 0 : index
    %1 = vector.load %arg3[%c0_1, %c0_2] : memref<256x256xbf16, #tpu.memory_space<vmem>>, vector<256x256xbf16>
    %cst = arith.constant dense<0.000000e+00> : vector<256x256xf32>
    %2 = tpu.matmul %0, %1, %cst {dimension_numbers = #tpu.dot_dimension_numbers<[1], [0], [0], [1], [0, 0, 1, 1], [], []>} : vector<256x256xbf16>, vector<256x256xbf16>, vector<256x256xf32> -> vector<256x256xf32>
    %c0_3 = arith.constant 0 : index
    %c0_4 = arith.constant 0 : index
    %3 = vector.load %arg4[%c0_3, %c0_4] : memref<256x256xf32, #tpu.memory_space<vmem>>, vector<256x256xf32>
    tpu.vector_store %arg4[%c0_3, %c0_4], %2 {strides = array<i32>} : memref<256x256xf32, #tpu.memory_space<vmem>>, vector<256x256xf32>,
    return
  }
  func.func @transform_0(%arg0: i32, %arg1: i32) -> (i32, i32) {
    %c0_i32 = arith.constant 0 : i32
    %c0_i32_0 = arith.constant 0 : i32
    return %arg0, %c0_i32 : i32, i32
  }
  func.func @transform_1(%arg0: i32, %arg1: i32) -> (i32, i32) {
    %c0_i32 = arith.constant 0 : i32
    %c0_i32_0 = arith.constant 0 : i32
    return %c0_i32, %arg1 : i32, i32
  }
  func.func @transform_2(%arg0: i32, %arg1: i32) -> (i32, i32) {
    %c0_i32 = arith.constant 0 : i32
    return %arg0, %arg1 : i32, i32
  }
}

</mosaic_0001>

<bundles_post_ra>
// kernel: mp_linear.1
= control target key start
LH: loop header
LB: loop body
LE: loop exit
PB: predicated region body
PF: predicated region fallthrough
CT: control target
= control target key end

     0   :  { %7 = vsyncpa [#allocation3], 0  ;;  %s2014_s0 = inlined_call_operand.vmem [shape: bf16[512,256], index: 0, kind: input, shape index: {}]   ;;  %s2015_s1 = inlined_call_operand.vmem [shape: bf16[256,256], index: 1, kind: input, shape index: {}]   ;;  %s2016_s2 = inlined_call_operand.hbm [shape: f32[512,256], index: 2, kind: output, shape index: {}]  }
   0x1   :  { %9 = vsyncpa [#allocation3 + $0x1], 0  ;;  %s1589_s9 = smov 0   ;;  %s1591_s10 = smov 0  }
   0x2   :  { %s1593_s11 = smov 0   ;;  %s1595_s12 = smov 0  }
   0x3   :  { %s1597_s13 = smov 0   ;;  %s1599_s14 = smov 0  }
   0x4 LB: > { %s1096_s15 = sadd.s32 4294967295, %s1570_s14   ;;  %s1097_s16 = sadd.s32 4294967294, %s1570_s14   ;;  %s1570_s14 = sphi %s1599_s14, %s15_s14   ;;  %s1566_s13 = sphi %s1597_s13, %s2023_s13   ;;  %s1562_s12 = sphi %s1595_s12, %s2022_s12   ;;  %s1558_s11 = sphi %s1593_s11, %s2021_s11   ;;  %s1554_s10 = sphi %s1591_s10, %s2020_s10   ;;  %s1550_s9 = sphi %s1589_s9, %s2019_s9  }
   0x5   : > { %s27_s17 = sadd.s32 1, %s1566_s13  ;;  %s88_s18 = sadd.s32 1, %s1558_s11 }
   0x6   : > { %p29_p0 = scmp.ge.s32.totalorder %s27_s17, 2  ;;  %p98_p1 = scmp.ne.s32.totalorder %s1558_s11, %s1554_s10 }
   0x7   : > { %p99_p2 = scmp.eq.s32.totalorder %s1096_s15, 1  ;;  %p104_p3 = scmp.ne.s32.totalorder %s1554_s10, %s1550_s9 }
   0x8   : > { %s2025_s17 = smov (%p29_p0, %s27_s17), 0  ;;  %p105_p5 = scmp.eq.s32.totalorder %s1097_s16, 1 }
   0x9   : > { %p1629_p4 = por %p99_p2, %p98_p1  ;;  %s83_s20 = ssub.s32 %s1566_s13, %s2025_s17 }
   0xa   : > { %p1101_p6 = scmp.ge.s32.totalorder %s1570_s14, 1  ;;  %p86_p7 = scmp.eq.s32.totalorder %s83_s20, 0 }
   0xb   : > { %p1636_p8 = por %p105_p5, %p104_p3  ;;  %p142_p9 = scmp.lt.s32.totalorder %s1570_s14, 3 }
   0xc   : > { %s1642_s22 = scalar_select %p86_p7, %s1558_s11, %s88_s18  }
   0xd   : > { %p143_p10 = pnand %p1101_p6, %p142_p9 }
   0xe   : > { %s1103_s23 = sshll.u32 (!%p143_p10), %s1562_s12, 5  ;;  %s1434_s5 = sshll.u32 (!%p143_p10), %s1562_s12, 9 }
   0xf   : > { %146 = sbr.rel (%p143_p10) target bundleno = 442 (0x1ba), region = 28  ;;  %p171_p11 = scmp.lt.s32.totalorder (!%p143_p10), %s1103_s23, 63 }
  0x10   : > { %s1004_s8 = scalar_lea.hbm (!%p143_p10), %s2016_s2, %s1434_s5  ;;  %s1512_s26 = scalar_lea.hbm (!%p143_p10), %s2016_s2, 1024 }
  0x11   : > { %s1007_s16 = sshll.u32 (!%p143_p10), %s1004_s8, 4  ;;  %s1008_s16 = int_to_ptr.hbm [resolvable:$true] %s1007_s16 }
  0x12   : > { %s1506_s18 = sshra.s32 (!%p143_p10), %s1008_s16, 4  ;;  %s1507_s18 = int_to_ptr.hbm [resolvable:$true] %s1506_s18 }
  0x13   : > { %s1508_s20 = scalar_lea.hbm (!%p143_p10), %s1507_s18, 512  ;;  %p1513_p1 = scmp.lt.s32.totalorder (!%p143_p10), %s1507_s18, %s2016_s2 }
  0x14   : > { %v1292_v0 = vld [vmem:[%s2015_s1 + $0x70] sm:$0xf]  ;;  %v1416_v1 = vld [vmem:[%s2015_s1 + $0x74] sm:$0xf0]  ;;  %v1415_v5 = vld [vmem:[%s2015_s1 + $0x74] sm:$0xf]  ;;  %p1509_p12 = scmp.ne.s32.totalorder %s1507_s18, %s1508_s20  ;;  %p1514_p2 = scmp.lt.s32.totalorder %s1512_s26, %s1508_s20 }
  0x15   : > { %v1356_v2 = vld [vmem:[%s2015_s1 + $0xf0] sm:$0xf]  ;;  %v1293_v3 = vor.u32 %v1416_v1, %v1292_v0  ;;  %v1432_v4 = vld [vmem:[%s2015_s1 + $0xf4] sm:$0xf0]  ;;  %v1294_v6 = vld [vmem:[%s2015_s1 + $0x78] sm:$0xf0] }
  0x16   : > { %v1357_v7 = vor.u32 %v1432_v4, %v1356_v2  ;;  %v1297_v8 = vor.u32 %v1415_v5, %v1294_v6  ;;  %v1431_v9 = vld [vmem:[%s2015_s1 + $0xf4] sm:$0xf]  ;;  %v1358_v10 = vld [vmem:[%s2015_s1 + $0xf8] sm:$0xf0]  ;;  %v1284_v11 = vld [vmem:[%s2015_s1 + $0x60] sm:$0xf]  ;;  %p1510_p13 = pnand %p1509_p12, %p1629_p4  ;;  %p1515_p3 = por %p1514_p2, %p1513_p1 }
  0x17   : > { %569 = vmatpush.bf16.msra.mxu0 %v1293_v3  ;;  %v1361_v12 = vor.u32 %v1431_v9, %v1358_v10  ;;  %v1414_v13 = vld [vmem:[%s2015_s1 + $0x64] sm:$0xf0]  ;;  %v1348_v14 = vld [vmem:[%s2015_s1 + $0xe0] sm:$0xf]  ;;  %v1413_v18 = vld [vmem:[%s2015_s1 + $0x64] sm:$0xf] }
  0x18   : > { %v1430_v15 = vld [vmem:[%s2015_s1 + $0xe4] sm:$0xf0]  ;;  %658 = vmatpush.bf16.msra.mxu1 %v1357_v7  ;;  %747 = vmatpush.bf16.msra.mxu2 %v1297_v8  ;;  %v1285_v16 = vor.u32 %v1414_v13, %v1284_v11  ;;  %v1286_v19 = vld [vmem:[%s2015_s1 + $0x68] sm:$0xf0]  ;;  %v1429_v20 = vld [vmem:[%s2015_s1 + $0xe4] sm:$0xf]  ;;  %p1511_p0 = pneg %p1510_p13 }
  0x19   : > { %v1349_v17 = vor.u32 %v1430_v15, %v1348_v14  ;;  %836 = vmatpush.bf16.msra.mxu3 %v1361_v12  ;;  %v1289_v21 = vor.u32 %v1413_v18, %v1286_v19  ;;  %v1350_v22 = vld [vmem:[%s2015_s1 + $0xe8] sm:$0xf0]  ;;  %v1276_v23 = vld [vmem:[%s2015_s1 + $0x50] sm:$0xf]  ;;  %v1412_v24 = vld [vmem:[%s2015_s1 + $0x54] sm:$0xf0] }
  0x1a   : > { %v1353_v25 = vor.u32 %v1429_v20, %v1350_v22  ;;  %v1340_v26 = vld [vmem:[%s2015_s1 + $0xd0] sm:$0xf]  ;;  %v1428_v27 = vld [vmem:[%s2015_s1 + $0xd4] sm:$0xf0]  ;;  %v1411_v28 = vld [vmem:[%s2015_s1 + $0x54] sm:$0xf]  ;;  %v1277_v29 = vor.u32 %v1412_v24, %v1276_v23  ;;  %p1516_p5 = pnand %p1515_p3, %p1511_p0 }
  0x1b   : > { %570 = vmatpush.bf16.msra.mxu0 %v1285_v16  ;;  %v1278_v30 = vld [vmem:[%s2015_s1 + $0x58] sm:$0xf0]  ;;  %v1427_v31 = vld [vmem:[%s2015_s1 + $0xd4] sm:$0xf]  ;;  %v1341_v33 = vor.u32 %v1428_v27, %v1340_v26  ;;  %v1268_v35 = vld [vmem:[%s2015_s1 + $0x40] sm:$0xf] }
  0x1c   : > { %v1342_v32 = vld [vmem:[%s2015_s1 + $0xd8] sm:$0xf0]  ;;  %659 = vmatpush.bf16.msra.mxu1 %v1349_v17  ;;  %748 = vmatpush.bf16.msra.mxu2 %v1289_v21  ;;  %v1281_v34 = vor.u32 %v1411_v28, %v1278_v30  ;;  %v1410_v36 = vld [vmem:[%s2015_s1 + $0x44] sm:$0xf0]  ;;  %v1332_v37 = vld [vmem:[%s2015_s1 + $0xc0] sm:$0xf] }
  0x1d   : > { %837 = vmatpush.bf16.msra.mxu3 %v1353_v25  ;;  %v1345_v38 = vor.u32 %v1427_v31, %v1342_v32  ;;  %v1426_v39 = vld [vmem:[%s2015_s1 + $0xc4] sm:$0xf0]  ;;  %v1409_v40 = vld [vmem:[%s2015_s1 + $0x44] sm:$0xf]  ;;  %v1270_v41 = vld [vmem:[%s2015_s1 + $0x48] sm:$0xf0]  ;;  %v1269_v44 = vor.u32 %v1410_v36, %v1268_v35 }
  0x1e   : > { %v1425_v42 = vld [vmem:[%s2015_s1 + $0xc4] sm:$0xf]  ;;  %v1334_v43 = vld [vmem:[%s2015_s1 + $0xc8] sm:$0xf0]  ;;  %v1333_v45 = vor.u32 %v1426_v39, %v1332_v37  ;;  %v1273_v46 = vor.u32 %v1409_v40, %v1270_v41  ;;  %v1260_v47 = vld [vmem:[%s2015_s1 + $0x30] sm:$0xf] }
  0x1f   : > { %571 = vmatpush.bf16.msra.mxu0 %v1277_v29  ;;  %v1408_v48 = vld [vmem:[%s2015_s1 + $0x34] sm:$0xf0]  ;;  %v1324_v49 = vld [vmem:[%s2015_s1 + $0xb0] sm:$0xf]  ;;  %v1337_v50 = vor.u32 %v1425_v42, %v1334_v43  ;;  %v1407_v52 = vld [vmem:[%s2015_s1 + $0x34] sm:$0xf] }
  0x20   : > { %660 = vmatpush.bf16.msra.mxu1 %v1341_v33  ;;  %749 = vmatpush.bf16.msra.mxu2 %v1281_v34  ;;  %v1424_v51 = vld [vmem:[%s2015_s1 + $0xb4] sm:$0xf0]  ;;  %v1262_v53 = vld [vmem:[%s2015_s1 + $0x38] sm:$0xf0]  ;;  %v1423_v54 = vld [vmem:[%s2015_s1 + $0xb4] sm:$0xf]  ;;  %v1261_v56 = vor.u32 %v1408_v48, %v1260_v47 }
  0x21   : > { %838 = vmatpush.bf16.msra.mxu3 %v1345_v38  ;;  %v1326_v55 = vld [vmem:[%s2015_s1 + $0xb8] sm:$0xf0]  ;;  %v1325_v57 = vor.u32 %v1424_v51, %v1324_v49  ;;  %v1265_v58 = vor.u32 %v1407_v52, %v1262_v53  ;;  %v1252_v59 = vld [vmem:[%s2015_s1 + $0x20] sm:$0xf]  ;;  %v1406_v60 = vld [vmem:[%s2015_s1 + $0x24] sm:$0xf0] }
  0x22   : > { %v1316_v61 = vld [vmem:[%s2015_s1 + $0xa0] sm:$0xf]  ;;  %v1329_v62 = vor.u32 %v1423_v54, %v1326_v55  ;;  %v1422_v63 = vld [vmem:[%s2015_s1 + $0xa4] sm:$0xf0]  ;;  %v1405_v0 = vld [vmem:[%s2015_s1 + $0x24] sm:$0xf]  ;;  %v1253_v4 = vor.u32 %v1406_v60, %v1252_v59 }
  0x23   : > { %572 = vmatpush.bf16.msra.mxu0 %v1269_v44  ;;  %v1254_v1 = vld [vmem:[%s2015_s1 + $0x28] sm:$0xf0]  ;;  %v1421_v2 = vld [vmem:[%s2015_s1 + $0xa4] sm:$0xf]  ;;  %v1244_v5 = vld [vmem:[%s2015_s1 + $0x10] sm:$0xf]  ;;  %v1317_v6 = vor.u32 %v1422_v63, %v1316_v61 }
  0x24   : > { %661 = vmatpush.bf16.msra.mxu1 %v1333_v45  ;;  %750 = vmatpush.bf16.msra.mxu2 %v1273_v46  ;;  %v1318_v3 = vld [vmem:[%s2015_s1 + $0xa8] sm:$0xf0]  ;;  %v1257_v7 = vor.u32 %v1405_v0, %v1254_v1  ;;  %v1404_v8 = vld [vmem:[%s2015_s1 + $0x14] sm:$0xf0]  ;;  %v1308_v9 = vld [vmem:[%s2015_s1 + $0x90] sm:$0xf] }
  0x25   : > { %839 = vmatpush.bf16.msra.mxu3 %v1337_v50  ;;  %v1420_v10 = vld [vmem:[%s2015_s1 + $0x94] sm:$0xf0]  ;;  %v1321_v11 = vor.u32 %v1421_v2, %v1318_v3  ;;  %v1403_v12 = vld [vmem:[%s2015_s1 + $0x14] sm:$0xf]  ;;  %v1246_v13 = vld [vmem:[%s2015_s1 + $0x18] sm:$0xf0]  ;;  %v1245_v16 = vor.u32 %v1404_v8, %v1244_v5 }
  0x26   : > { %v1419_v14 = vld [vmem:[%s2015_s1 + $0x94] sm:$0xf]  ;;  %v1310_v15 = vld [vmem:[%s2015_s1 + $0x98] sm:$0xf0]  ;;  %v1236_v17 = vld [vmem:[%s2015_s1] sm:$0xf]  ;;  %v1309_v18 = vor.u32 %v1420_v10, %v1308_v9  ;;  %v1249_v19 = vor.u32 %v1403_v12, %v1246_v13 }
  0x27   : > { %573 = vmatpush.bf16.msra.mxu0 %v1261_v56  ;;  %v1402_v20 = vld [vmem:[%s2015_s1 + $0x4] sm:$0xf0]  ;;  %v1300_v21 = vld [vmem:[%s2015_s1 + $0x80] sm:$0xf]  ;;  %s2027_s23 = smov (!%p171_p11, %s1103_s23), 63  ;;  %v1313_v22 = vor.u32 %v1419_v14, %v1310_v15 }
  0x28   : > { %662 = vmatpush.bf16.msra.mxu1 %v1325_v57  ;;  %751 = vmatpush.bf16.msra.mxu2 %v1265_v58  ;;  %v1418_v23 = vld [vmem:[%s2015_s1 + $0x84] sm:$0xf0]  ;;  %v1401_v24 = vld [vmem:[%s2015_s1 + $0x4] sm:$0xf]  ;;  %v1238_v25 = vld [vmem:[%s2015_s1 + $0x8] sm:$0xf0]  ;;  %v1237_v28 = vor.u32 %v1402_v20, %v1236_v17 }
  0x29   : > { %840 = vmatpush.bf16.msra.mxu3 %v1329_v62  ;;  %v1417_v26 = vld [vmem:[%s2015_s1 + $0x84] sm:$0xf]  ;;  %v1302_v27 = vld [vmem:[%s2015_s1 + $0x88] sm:$0xf0]  ;;  %s1368_s27 = sshll.u32 %s2027_s23, 3  ;;  %v1301_v29 = vor.u32 %v1418_v23, %v1300_v21  ;;  %v1241_v30 = vor.u32 %v1401_v24, %v1238_v25  ;;  %s167_s23 = sand.u32 1, %s1554_s10  }
  0x2a   : > { %s1840_s30 = scalar_lea.vmem %s2014_s0, %s1368_s27  ;;  %v1305_v34 = vor.u32 %v1417_v26, %v1302_v27  ;;  %s1102_s3 = sshll.u32 %s167_s23, 9 }
  0x2b   : > { %574 = vmatpush.bf16.msra.mxu0 %v1253_v4  ;;  %v1108_v31 = vld [vmem:[%s1840_s30] sm:$0xf]  ;;  %v1370_v32 = vld [vmem:[%s1840_s30 + $0x4] sm:$0xf0]  ;;  %v1369_v33 = vld [vmem:[%s1840_s30 + $0x4] sm:$0xf] }
  0x2c   : > { %663 = vmatpush.bf16.msra.mxu1 %v1317_v6  ;;  %752 = vmatpush.bf16.msra.mxu2 %v1257_v7  ;;  %v1110_v35 = vld [vmem:[%s1840_s30 + $0x8] sm:$0xf0]  ;;  %v1109_v36 = vor.u32 %v1370_v32, %v1108_v31  ;;  %v1116_v38 = vld [vmem:[%s1840_s30 + $0x10] sm:$0xf]  ;;  %v1372_v39 = vld [vmem:[%s1840_s30 + $0x14] sm:$0xf0] }
  0x2d   : > { %841 = vmatpush.bf16.msra.mxu3 %v1321_v11  ;;  %v1113_v37 = vor.u32 %v1369_v33, %v1110_v35  ;;  %v1371_v40 = vld [vmem:[%s1840_s30 + $0x14] sm:$0xf]  ;;  %v1118_v41 = vld [vmem:[%s1840_s30 + $0x18] sm:$0xf0]  ;;  %v1117_v42 = vor.u32 %v1372_v39, %v1116_v38  ;;  %v1124_v44 = vld [vmem:[%s1840_s30 + $0x20] sm:$0xf] }
  0x2e   : > { %v1121_v43 = vor.u32 %v1371_v40, %v1118_v41  ;;  %v1374_v45 = vld [vmem:[%s1840_s30 + $0x24] sm:$0xf0]  ;;  %v1373_v46 = vld [vmem:[%s1840_s30 + $0x24] sm:$0xf]  ;;  %v1126_v47 = vld [vmem:[%s1840_s30 + $0x28] sm:$0xf0] }
  0x2f   : > { %575 = vmatpush.bf16.msra.mxu0 %v1245_v16  ;;  %v1125_v48 = vor.u32 %v1374_v45, %v1124_v44  ;;  %v1129_v49 = vor.u32 %v1373_v46, %v1126_v47  ;;  %v1132_v50 = vld [vmem:[%s1840_s30 + $0x30] sm:$0xf]  ;;  %v1376_v51 = vld [vmem:[%s1840_s30 + $0x34] sm:$0xf0]  ;;  %v1375_v52 = vld [vmem:[%s1840_s30 + $0x34] sm:$0xf] }
  0x30   : > { %664 = vmatpush.bf16.msra.mxu1 %v1309_v18  ;;  %753 = vmatpush.bf16.msra.mxu2 %v1249_v19  ;;  %v1134_v53 = vld [vmem:[%s1840_s30 + $0x38] sm:$0xf0]  ;;  %v1133_v54 = vor.u32 %v1376_v51, %v1132_v50  ;;  %v1140_v56 = vld [vmem:[%s1840_s30 + $0x40] sm:$0xf]  ;;  %v1378_v57 = vld [vmem:[%s1840_s30 + $0x44] sm:$0xf0] }
  0x31   : > { %842 = vmatpush.bf16.msra.mxu3 %v1313_v22  ;;  %v1137_v55 = vor.u32 %v1375_v52, %v1134_v53  ;;  %v1377_v58 = vld [vmem:[%s1840_s30 + $0x44] sm:$0xf]  ;;  %v1142_v59 = vld [vmem:[%s1840_s30 + $0x48] sm:$0xf0]  ;;  %v1141_v60 = vor.u32 %v1378_v57, %v1140_v56  ;;  %v1148_v62 = vld [vmem:[%s1840_s30 + $0x50] sm:$0xf] }
  0x32   : > { %v1145_v61 = vor.u32 %v1377_v58, %v1142_v59  ;;  %v1380_v63 = vld [vmem:[%s1840_s30 + $0x54] sm:$0xf0]  ;;  %v1379_v0 = vld [vmem:[%s1840_s30 + $0x54] sm:$0xf]  ;;  %v1150_v1 = vld [vmem:[%s1840_s30 + $0x58] sm:$0xf0] }
  0x33   : > { %576 = vmatpush.bf16.msra.mxu0 %v1237_v28  ;;  %v1149_v2 = vor.u32 %v1380_v63, %v1148_v62  ;;  %v1153_v3 = vor.u32 %v1379_v0, %v1150_v1  ;;  %v1156_v4 = vld [vmem:[%s1840_s30 + $0x60] sm:$0xf]  ;;  %v1382_v5 = vld [vmem:[%s1840_s30 + $0x64] sm:$0xf0]  ;;  %v1381_v6 = vld [vmem:[%s1840_s30 + $0x64] sm:$0xf] }
  0x34   : > { %665 = vmatpush.bf16.msra.mxu1 %v1301_v29  ;;  %754 = vmatpush.bf16.msra.mxu2 %v1241_v30  ;;  %v1158_v7 = vld [vmem:[%s1840_s30 + $0x68] sm:$0xf0]  ;;  %v1157_v8 = vor.u32 %v1382_v5, %v1156_v4  ;;  %v1164_v10 = vld [vmem:[%s1840_s30 + $0x70] sm:$0xf]  ;;  %v1384_v11 = vld [vmem:[%s1840_s30 + $0x74] sm:$0xf0] }
  0x35   : > { %843 = vmatpush.bf16.msra.mxu3 %v1305_v34  ;;  %v1161_v9 = vor.u32 %v1381_v6, %v1158_v7  ;;  %v1383_v12 = vld [vmem:[%s1840_s30 + $0x74] sm:$0xf]  ;;  %v1166_v13 = vld [vmem:[%s1840_s30 + $0x78] sm:$0xf0]  ;;  %v1165_v14 = vor.u32 %v1384_v11, %v1164_v10  ;;  %v1172_v16 = vld [vmem:[%s1840_s30 + $0x80] sm:$0xf] }
  0x36   : > { %577 = vmatmul.bf16.vlgmr.msra.gmra.mxu0 %v1109_v36  ;;  %v1169_v15 = vor.u32 %v1383_v12, %v1166_v13  ;;  %v1386_v17 = vld [vmem:[%s1840_s30 + $0x84] sm:$0xf0]  ;;  %v1385_v18 = vld [vmem:[%s1840_s30 + $0x84] sm:$0xf]  ;;  %v1174_v19 = vld [vmem:[%s1840_s30 + $0x88] sm:$0xf0] }
  0x37   : > { %666 = vmatmul.bf16.vlgmr.msra.gmra.mxu1 %v1113_v37  ;;  %755 = vmatmul.bf16.vlgmr.msra.gmra.mxu2 %v1109_v36  ;;  %v1173_v20 = vor.u32 %v1386_v17, %v1172_v16  ;;  %v1177_v22 = vor.u32 %v1385_v18, %v1174_v19  ;;  %s1881_s4 = scalar_lea.vmem [#allocation2], %s1102_s3  ;;  %v1180_v31 = vld [vmem:[%s1840_s30 + $0x90] sm:$0xf]  ;;  %v1388_v32 = vld [vmem:[%s1840_s30 + $0x94] sm:$0xf0]  ;;  %s990_s12 = scalar_lea.sflag [#allocation3], %s167_s23 }
  0x38   : > { %844 = vmatmul.bf16.vlgmr.msra.gmra.mxu3 %v1113_v37  ;;  %v1387_v33 = vld [vmem:[%s1840_s30 + $0x94] sm:$0xf]  ;;  %v1182_v34 = vld [vmem:[%s1840_s30 + $0x98] sm:$0xf0]  ;;  %v1181_v36 = vor.u32 %v1388_v32, %v1180_v31  ;;  %v1390_v50 = vld [vmem:[%s1840_s30 + $0xa4] sm:$0xf0] }
  0x39   : > { %v1185_v39 = vor.u32 %v1387_v33, %v1182_v34  ;;  %v1389_v51 = vld [vmem:[%s1840_s30 + $0xa4] sm:$0xf]  ;;  %v1190_v52 = vld [vmem:[%s1840_s30 + $0xa8] sm:$0xf0]  ;;  %v1392_v4 = vld [vmem:[%s1840_s30 + $0xb4] sm:$0xf0] }
  0x3a   : > { %v1193_v57 = vor.u32 %v1389_v51, %v1190_v52  ;;  %v1391_v5 = vld [vmem:[%s1840_s30 + $0xb4] sm:$0xf]  ;;  %v1198_v6 = vld [vmem:[%s1840_s30 + $0xb8] sm:$0xf0]  ;;  %s1005_s15 = sshll.u32 %s1881_s4, 4  ;;  %s1006_s15 = int_to_ptr.vmem [resolvable:$true] %s1005_s15 }
  0x3b   : > { %v1201_v11 = vor.u32 %v1391_v5, %v1198_v6 }
  0x46   : > { %582 = vmatmul.bf16.gmra.mxu0 %v1117_v42 }
  0x47   : > { %671 = vmatmul.bf16.gmra.mxu1 %v1121_v43  ;;  %760 = vmatmul.bf16.gmra.mxu2 %v1117_v42 }
  0x48   : > { %849 = vmatmul.bf16.gmra.mxu3 %v1121_v43 }
  0x56   : > { %587 = vmatmul.bf16.gmra.mxu0 %v1125_v48 }
  0x57   : > { %676 = vmatmul.bf16.gmra.mxu1 %v1129_v49  ;;  %765 = vmatmul.bf16.gmra.mxu2 %v1125_v48 }
  0x58   : > { %854 = vmatmul.bf16.gmra.mxu3 %v1129_v49  ;;  %v1188_v49 = vld [vmem:[%s1840_s30 + $0xa0] sm:$0xf] }
  0x66   : > { %592 = vmatmul.bf16.gmra.mxu0 %v1133_v54 }
  0x67   : > { %681 = vmatmul.bf16.gmra.mxu1 %v1137_v55  ;;  %770 = vmatmul.bf16.gmra.mxu2 %v1133_v54  ;;  %v1189_v54 = vor.u32 %v1390_v50, %v1188_v49 }
  0x68   : > { %859 = vmatmul.bf16.gmra.mxu3 %v1137_v55 }
  0x76   : > { %597 = vmatmul.bf16.gmra.mxu0 %v1141_v60 }
  0x77   : > { %686 = vmatmul.bf16.gmra.mxu1 %v1145_v61  ;;  %775 = vmatmul.bf16.gmra.mxu2 %v1141_v60 }
  0x78   : > { %864 = vmatmul.bf16.gmra.mxu3 %v1145_v61 }
  0x86   : > { %602 = vmatmul.bf16.gmra.mxu0 %v1149_v2 }
  0x87   : > { %691 = vmatmul.bf16.gmra.mxu1 %v1153_v3  ;;  %780 = vmatmul.bf16.gmra.mxu2 %v1149_v2 }
  0x88   : > { %869 = vmatmul.bf16.gmra.mxu3 %v1153_v3  ;;  %v1196_v3 = vld [vmem:[%s1840_s30 + $0xb0] sm:$0xf] }
  0x96   : > { %607 = vmatmul.bf16.gmra.mxu0 %v1157_v8 }
  0x97   : > { %696 = vmatmul.bf16.gmra.mxu1 %v1161_v9  ;;  %785 = vmatmul.bf16.gmra.mxu2 %v1157_v8  ;;  %v1197_v8 = vor.u32 %v1392_v4, %v1196_v3 }
  0x98   : > { %874 = vmatmul.bf16.gmra.mxu3 %v1161_v9 }
  0xa6   : > { %612 = vmatmul.bf16.gmra.mxu0 %v1165_v14 }
  0xa7   : > { %701 = vmatmul.bf16.gmra.mxu1 %v1169_v15  ;;  %790 = vmatmul.bf16.gmra.mxu2 %v1165_v14 }
  0xa8   : > { %879 = vmatmul.bf16.gmra.mxu3 %v1169_v15 }
  0xb3   : > { %v578_v21 = vpop.f32.mrf.mxu0 }
  0xb4   : > { %v667_v23 = vpop.f32.mrf.mxu1 }
  0xb5   : > { %v668_v24 = vadd.f32 %v667_v23, %v578_v21  ;;  %v1204_v21 = vld [vmem:[%s1840_s30 + $0xc0] sm:$0xf]  ;;  %v1393_v23 = vld [vmem:[%s1840_s30 + $0xc4] sm:$0xf] }
  0xb6   : > { %617 = vmatmul.bf16.gmra.mxu0 %v1173_v20 }
  0xb7   : > { %925 = vst [vmem:[%s1881_s4] sm:$0xff] %v668_v24  ;;  %706 = vmatmul.bf16.gmra.mxu1 %v1177_v22  ;;  %795 = vmatmul.bf16.gmra.mxu2 %v1173_v20  ;;  %v1206_v24 = vld [vmem:[%s1840_s30 + $0xc8] sm:$0xf0] }
  0xb8   : > { %884 = vmatmul.bf16.gmra.mxu3 %v1177_v22  ;;  %v1394_v22 = vld [vmem:[%s1840_s30 + $0xc4] sm:$0xf0] }
  0xba   : > { %v756_v25 = vpop.f32.mrf.mxu2 }
  0xbb   : > { %v845_v26 = vpop.f32.mrf.mxu3  ;;  %v580_v27 = vpop.f32.mrf.mxu0 }
  0xbc   : > { %v846_v28 = vadd.f32 %v845_v26, %v756_v25  ;;  %v669_v29 = vpop.f32.mrf.mxu1  ;;  %v1205_v26 = vor.u32 %v1394_v22, %v1204_v21 }
  0xbd   : > { %v670_v30 = vadd.f32 %v669_v29, %v580_v27  ;;  %v1209_v29 = vor.u32 %v1393_v23, %v1206_v24 }
  0xbe   : > { %926 = vst [vmem:[%s1881_s4 + $0x8] sm:$0xff] %v846_v28 }
  0xbf   : > { %927 = vst [vmem:[%s1881_s4 + $0x10] sm:$0xff] %v670_v30 }
  0xc2   : > { %v758_v35 = vpop.f32.mrf.mxu2 }
  0xc3   : > { %v847_v37 = vpop.f32.mrf.mxu3  ;;  %v583_v38 = vpop.f32.mrf.mxu0 }
  0xc4   : > { %v848_v40 = vadd.f32 %v847_v37, %v758_v35  ;;  %v672_v41 = vpop.f32.mrf.mxu1 }
  0xc5   : > { %v673_v42 = vadd.f32 %v672_v41, %v583_v38  ;;  %v1395_v41 = vld [vmem:[%s1840_s30 + $0xd4] sm:$0xf] }
  0xc6   : > { %928 = vst [vmem:[%s1881_s4 + $0x18] sm:$0xff] %v848_v40  ;;  %622 = vmatmul.bf16.gmra.mxu0 %v1181_v36  ;;  %v1396_v40 = vld [vmem:[%s1840_s30 + $0xd4] sm:$0xf0] }
  0xc7   : > { %929 = vst [vmem:[%s1881_s4 + $0x20] sm:$0xff] %v673_v42  ;;  %711 = vmatmul.bf16.gmra.mxu1 %v1185_v39  ;;  %800 = vmatmul.bf16.gmra.mxu2 %v1181_v36  ;;  %v1214_v42 = vld [vmem:[%s1840_s30 + $0xd8] sm:$0xf0] }
  0xc8   : > { %889 = vmatmul.bf16.gmra.mxu3 %v1185_v39  ;;  %v1212_v39 = vld [vmem:[%s1840_s30 + $0xd0] sm:$0xf] }
  0xca   : > { %v761_v43 = vpop.f32.mrf.mxu2 }
  0xcb   : > { %v850_v44 = vpop.f32.mrf.mxu3  ;;  %v585_v45 = vpop.f32.mrf.mxu0 }
  0xcc   : > { %v851_v46 = vadd.f32 %v850_v44, %v761_v43  ;;  %v674_v47 = vpop.f32.mrf.mxu1  ;;  %v1213_v44 = vor.u32 %v1396_v40, %v1212_v39 }
  0xcd   : > { %v675_v48 = vadd.f32 %v674_v47, %v585_v45  ;;  %v1217_v47 = vor.u32 %v1395_v41, %v1214_v42 }
  0xce   : > { %930 = vst [vmem:[%s1881_s4 + $0x28] sm:$0xff] %v851_v46 }
  0xcf   : > { %931 = vst [vmem:[%s1881_s4 + $0x30] sm:$0xff] %v675_v48 }
  0xd2   : > { %v763_v53 = vpop.f32.mrf.mxu2 }
  0xd3   : > { %v852_v55 = vpop.f32.mrf.mxu3  ;;  %v588_v56 = vpop.f32.mrf.mxu0 }
  0xd4   : > { %v853_v58 = vadd.f32 %v852_v55, %v763_v53  ;;  %v677_v59 = vpop.f32.mrf.mxu1 }
  0xd5   : > { %v678_v60 = vadd.f32 %v677_v59, %v588_v56  ;;  %v1397_v59 = vld [vmem:[%s1840_s30 + $0xe4] sm:$0xf] }
  0xd6   : > { %932 = vst [vmem:[%s1881_s4 + $0x38] sm:$0xff] %v853_v58  ;;  %627 = vmatmul.bf16.gmra.mxu0 %v1189_v54  ;;  %v1398_v58 = vld [vmem:[%s1840_s30 + $0xe4] sm:$0xf0] }
  0xd7   : > { %933 = vst [vmem:[%s1881_s4 + $0x40] sm:$0xff] %v678_v60  ;;  %716 = vmatmul.bf16.gmra.mxu1 %v1193_v57  ;;  %805 = vmatmul.bf16.gmra.mxu2 %v1189_v54  ;;  %v1222_v60 = vld [vmem:[%s1840_s30 + $0xe8] sm:$0xf0] }
  0xd8   : > { %894 = vmatmul.bf16.gmra.mxu3 %v1193_v57  ;;  %v1220_v57 = vld [vmem:[%s1840_s30 + $0xe0] sm:$0xf] }
  0xda   : > { %v766_v61 = vpop.f32.mrf.mxu2 }
  0xdb   : > { %v855_v62 = vpop.f32.mrf.mxu3  ;;  %v590_v63 = vpop.f32.mrf.mxu0 }
  0xdc   : > { %v856_v0 = vadd.f32 %v855_v62, %v766_v61  ;;  %v679_v1 = vpop.f32.mrf.mxu1  ;;  %v1221_v62 = vor.u32 %v1398_v58, %v1220_v57 }
  0xdd   : > { %v680_v2 = vadd.f32 %v679_v1, %v590_v63  ;;  %v1225_v1 = vor.u32 %v1397_v59, %v1222_v60 }
  0xde   : > { %934 = vst [vmem:[%s1881_s4 + $0x48] sm:$0xff] %v856_v0 }
  0xdf   : > { %935 = vst [vmem:[%s1881_s4 + $0x50] sm:$0xff] %v680_v2 }
  0xe2   : > { %v768_v7 = vpop.f32.mrf.mxu2 }
  0xe3   : > { %v857_v9 = vpop.f32.mrf.mxu3  ;;  %v593_v10 = vpop.f32.mrf.mxu0 }
  0xe4   : > { %v858_v12 = vadd.f32 %v857_v9, %v768_v7  ;;  %v682_v13 = vpop.f32.mrf.mxu1 }
  0xe5   : > { %v683_v14 = vadd.f32 %v682_v13, %v593_v10  ;;  %v1399_v13 = vld [vmem:[%s1840_s30 + $0xf4] sm:$0xf] }
  0xe6   : > { %936 = vst [vmem:[%s1881_s4 + $0x58] sm:$0xff] %v858_v12  ;;  %632 = vmatmul.bf16.gmra.mxu0 %v1197_v8  ;;  %v1400_v12 = vld [vmem:[%s1840_s30 + $0xf4] sm:$0xf0] }
  0xe7   : > { %937 = vst [vmem:[%s1881_s4 + $0x60] sm:$0xff] %v683_v14  ;;  %721 = vmatmul.bf16.gmra.mxu1 %v1201_v11  ;;  %810 = vmatmul.bf16.gmra.mxu2 %v1197_v8  ;;  %v1230_v14 = vld [vmem:[%s1840_s30 + $0xf8] sm:$0xf0] }
  0xe8   : > { %899 = vmatmul.bf16.gmra.mxu3 %v1201_v11  ;;  %v1228_v11 = vld [vmem:[%s1840_s30 + $0xf0] sm:$0xf] }
  0xea   : > { %v771_v15 = vpop.f32.mrf.mxu2 }
  0xeb   : > { %v860_v16 = vpop.f32.mrf.mxu3  ;;  %v595_v17 = vpop.f32.mrf.mxu0 }
  0xec   : > { %v861_v18 = vadd.f32 %v860_v16, %v771_v15  ;;  %v684_v19 = vpop.f32.mrf.mxu1  ;;  %v1229_v16 = vor.u32 %v1400_v12, %v1228_v11 }
  0xed   : > { %v685_v20 = vadd.f32 %v684_v19, %v595_v17  ;;  %v1233_v19 = vor.u32 %v1399_v13, %v1230_v14 }
  0xee   : > { %938 = vst [vmem:[%s1881_s4 + $0x68] sm:$0xff] %v861_v18 }
  0xef   : > { %939 = vst [vmem:[%s1881_s4 + $0x70] sm:$0xff] %v685_v20 }
  0xf2   : > { %v773_v25 = vpop.f32.mrf.mxu2 }
  0xf3   : > { %v862_v27 = vpop.f32.mrf.mxu3  ;;  %v598_v28 = vpop.f32.mrf.mxu0 }
  0xf4   : > { %v863_v30 = vadd.f32 %v862_v27, %v773_v25  ;;  %v687_v31 = vpop.f32.mrf.mxu1 }
  0xf5   : > { %v688_v32 = vadd.f32 %v687_v31, %v598_v28 }
  0xf6   : > { %940 = vst [vmem:[%s1881_s4 + $0x78] sm:$0xff] %v863_v30  ;;  %637 = vmatmul.bf16.gmra.mxu0 %v1205_v26 }
  0xf7   : > { %941 = vst [vmem:[%s1881_s4 + $0x80] sm:$0xff] %v688_v32  ;;  %726 = vmatmul.bf16.gmra.mxu1 %v1209_v29  ;;  %815 = vmatmul.bf16.gmra.mxu2 %v1205_v26 }
  0xf8   : > { %904 = vmatmul.bf16.gmra.mxu3 %v1209_v29 }
  0xfa   : > { %v776_v33 = vpop.f32.mrf.mxu2 }
  0xfb   : > { %v865_v34 = vpop.f32.mrf.mxu3  ;;  %v600_v35 = vpop.f32.mrf.mxu0 }
  0xfc   : > { %v866_v36 = vadd.f32 %v865_v34, %v776_v33  ;;  %v689_v37 = vpop.f32.mrf.mxu1 }
  0xfd   : > { %v690_v38 = vadd.f32 %v689_v37, %v600_v35 }
  0xfe   : > { %942 = vst [vmem:[%s1881_s4 + $0x88] sm:$0xff] %v866_v36 }
  0xff   : > { %943 = vst [vmem:[%s1881_s4 + $0x90] sm:$0xff] %v690_v38 }
 0x102   : > { %v778_v43 = vpop.f32.mrf.mxu2 }
 0x103   : > { %v867_v45 = vpop.f32.mrf.mxu3  ;;  %v603_v46 = vpop.f32.mrf.mxu0 }
 0x104   : > { %v868_v48 = vadd.f32 %v867_v45, %v778_v43  ;;  %v692_v49 = vpop.f32.mrf.mxu1 }
 0x105   : > { %v693_v50 = vadd.f32 %v692_v49, %v603_v46 }
 0x106   : > { %944 = vst [vmem:[%s1881_s4 + $0x98] sm:$0xff] %v868_v48  ;;  %642 = vmatmul.bf16.gmra.mxu0 %v1213_v44 }
 0x107   : > { %945 = vst [vmem:[%s1881_s4 + $0xa0] sm:$0xff] %v693_v50  ;;  %731 = vmatmul.bf16.gmra.mxu1 %v1217_v47  ;;  %820 = vmatmul.bf16.gmra.mxu2 %v1213_v44 }
 0x108   : > { %909 = vmatmul.bf16.gmra.mxu3 %v1217_v47 }
 0x10a   : > { %v781_v51 = vpop.f32.mrf.mxu2 }
 0x10b   : > { %v870_v52 = vpop.f32.mrf.mxu3  ;;  %v605_v53 = vpop.f32.mrf.mxu0 }
 0x10c   : > { %v871_v54 = vadd.f32 %v870_v52, %v781_v51  ;;  %v694_v55 = vpop.f32.mrf.mxu1 }
 0x10d   : > { %v695_v56 = vadd.f32 %v694_v55, %v605_v53 }
 0x10e   : > { %946 = vst [vmem:[%s1881_s4 + $0xa8] sm:$0xff] %v871_v54 }
 0x10f   : > { %947 = vst [vmem:[%s1881_s4 + $0xb0] sm:$0xff] %v695_v56 }
 0x112   : > { %v783_v61 = vpop.f32.mrf.mxu2 }
 0x113   : > { %v872_v63 = vpop.f32.mrf.mxu3  ;;  %v608_v0 = vpop.f32.mrf.mxu0 }
 0x114   : > { %v873_v2 = vadd.f32 %v872_v63, %v783_v61  ;;  %v697_v3 = vpop.f32.mrf.mxu1 }
 0x115   : > { %v698_v4 = vadd.f32 %v697_v3, %v608_v0 }
 0x116   : > { %948 = vst [vmem:[%s1881_s4 + $0xb8] sm:$0xff] %v873_v2  ;;  %647 = vmatmul.bf16.gmra.mxu0 %v1221_v62 }
 0x117   : > { %949 = vst [vmem:[%s1881_s4 + $0xc0] sm:$0xff] %v698_v4  ;;  %736 = vmatmul.bf16.gmra.mxu1 %v1225_v1  ;;  %825 = vmatmul.bf16.gmra.mxu2 %v1221_v62 }
 0x118   : > { %914 = vmatmul.bf16.gmra.mxu3 %v1225_v1 }
 0x11a   : > { %v786_v5 = vpop.f32.mrf.mxu2 }
 0x11b   : > { %v875_v6 = vpop.f32.mrf.mxu3  ;;  %v610_v7 = vpop.f32.mrf.mxu0 }
 0x11c   : > { %v876_v8 = vadd.f32 %v875_v6, %v786_v5  ;;  %v699_v9 = vpop.f32.mrf.mxu1 }
 0x11d   : > { %v700_v10 = vadd.f32 %v699_v9, %v610_v7 }
 0x11e   : > { %950 = vst [vmem:[%s1881_s4 + $0xc8] sm:$0xff] %v876_v8 }
 0x11f   : > { %951 = vst [vmem:[%s1881_s4 + $0xd0] sm:$0xff] %v700_v10 }
 0x122   : > { %v788_v15 = vpop.f32.mrf.mxu2 }
 0x123   : > { %v877_v17 = vpop.f32.mrf.mxu3  ;;  %v613_v18 = vpop.f32.mrf.mxu0 }
 0x124   : > { %v878_v20 = vadd.f32 %v877_v17, %v788_v15  ;;  %v702_v21 = vpop.f32.mrf.mxu1 }
 0x125   : > { %v703_v22 = vadd.f32 %v702_v21, %v613_v18 }
 0x126   : > { %952 = vst [vmem:[%s1881_s4 + $0xd8] sm:$0xff] %v878_v20  ;;  %652 = vmatmul.bf16.gmra.mxu0 %v1229_v16 }
 0x127   : > { %953 = vst [vmem:[%s1881_s4 + $0xe0] sm:$0xff] %v703_v22  ;;  %741 = vmatmul.bf16.gmra.mxu1 %v1233_v19  ;;  %830 = vmatmul.bf16.gmra.mxu2 %v1229_v16 }
 0x128   : > { %919 = vmatmul.bf16.gmra.mxu3 %v1233_v19 }
 0x12a   : > { %v791_v23 = vpop.f32.mrf.mxu2 }
 0x12b   : > { %v880_v24 = vpop.f32.mrf.mxu3  ;;  %v615_v25 = vpop.f32.mrf.mxu0 }
 0x12c   : > { %v881_v26 = vadd.f32 %v880_v24, %v791_v23  ;;  %v704_v27 = vpop.f32.mrf.mxu1 }
 0x12d   : > { %v705_v28 = vadd.f32 %v704_v27, %v615_v25 }
 0x12e   : > { %954 = vst [vmem:[%s1881_s4 + $0xe8] sm:$0xff] %v881_v26 }
 0x12f   : > { %955 = vst [vmem:[%s1881_s4 + $0xf0] sm:$0xff] %v705_v28 }
 0x132   : > { %v793_v29 = vpop.f32.mrf.mxu2 }
 0x133   : > { %v882_v30 = vpop.f32.mrf.mxu3  ;;  %v618_v31 = vpop.f32.mrf.mxu0 }
 0x134   : > { %v883_v32 = vadd.f32 %v882_v30, %v793_v29  ;;  %v707_v33 = vpop.f32.mrf.mxu1 }
 0x135   : > { %v708_v34 = vadd.f32 %v707_v33, %v618_v31 }
 0x136   : > { %956 = vst [vmem:[%s1881_s4 + $0xf8] sm:$0xff] %v883_v32 }
 0x137   : > { %957 = vst [vmem:[%s1881_s4 + $0x100] sm:$0xff] %v708_v34 }
 0x13a   : > { %v796_v35 = vpop.f32.mrf.mxu2 }
 0x13b   : > { %v885_v36 = vpop.f32.mrf.mxu3  ;;  %v620_v37 = vpop.f32.mrf.mxu0 }
 0x13c   : > { %v886_v38 = vadd.f32 %v885_v36, %v796_v35  ;;  %v709_v39 = vpop.f32.mrf.mxu1 }
 0x13d   : > { %v710_v40 = vadd.f32 %v709_v39, %v620_v37 }
 0x13e   : > { %958 = vst [vmem:[%s1881_s4 + $0x108] sm:$0xff] %v886_v38 }
 0x13f   : > { %959 = vst [vmem:[%s1881_s4 + $0x110] sm:$0xff] %v710_v40 }
 0x142   : > { %v798_v41 = vpop.f32.mrf.mxu2 }
 0x143   : > { %v887_v42 = vpop.f32.mrf.mxu3  ;;  %v623_v43 = vpop.f32.mrf.mxu0 }
 0x144   : > { %v888_v44 = vadd.f32 %v887_v42, %v798_v41  ;;  %v712_v45 = vpop.f32.mrf.mxu1 }
 0x145   : > { %v713_v46 = vadd.f32 %v712_v45, %v623_v43 }
 0x146   : > { %960 = vst [vmem:[%s1881_s4 + $0x118] sm:$0xff] %v888_v44 }
 0x147   : > { %961 = vst [vmem:[%s1881_s4 + $0x120] sm:$0xff] %v713_v46 }
 0x14a   : > { %v801_v47 = vpop.f32.mrf.mxu2 }
 0x14b   : > { %v890_v48 = vpop.f32.mrf.mxu3  ;;  %v625_v49 = vpop.f32.mrf.mxu0 }
 0x14c   : > { %v891_v50 = vadd.f32 %v890_v48, %v801_v47  ;;  %v714_v51 = vpop.f32.mrf.mxu1 }
 0x14d   : > { %v715_v52 = vadd.f32 %v714_v51, %v625_v49 }
 0x14e   : > { %962 = vst [vmem:[%s1881_s4 + $0x128] sm:$0xff] %v891_v50 }
 0x14f   : > { %963 = vst [vmem:[%s1881_s4 + $0x130] sm:$0xff] %v715_v52 }
 0x152   : > { %v803_v53 = vpop.f32.mrf.mxu2 }
 0x153   : > { %v892_v54 = vpop.f32.mrf.mxu3  ;;  %v628_v55 = vpop.f32.mrf.mxu0 }
 0x154   : > { %v893_v56 = vadd.f32 %v892_v54, %v803_v53  ;;  %v717_v57 = vpop.f32.mrf.mxu1 }
 0x155   : > { %v718_v58 = vadd.f32 %v717_v57, %v628_v55 }
 0x156   : > { %964 = vst [vmem:[%s1881_s4 + $0x138] sm:$0xff] %v893_v56 }
 0x157   : > { %965 = vst [vmem:[%s1881_s4 + $0x140] sm:$0xff] %v718_v58 }
 0x15a   : > { %v806_v59 = vpop.f32.mrf.mxu2 }
 0x15b   : > { %v895_v60 = vpop.f32.mrf.mxu3  ;;  %v630_v61 = vpop.f32.mrf.mxu0 }
 0x15c   : > { %v896_v62 = vadd.f32 %v895_v60, %v806_v59  ;;  %v719_v63 = vpop.f32.mrf.mxu1 }
 0x15d   : > { %v720_v0 = vadd.f32 %v719_v63, %v630_v61 }
 0x15e   : > { %966 = vst [vmem:[%s1881_s4 + $0x148] sm:$0xff] %v896_v62 }
 0x15f   : > { %967 = vst [vmem:[%s1881_s4 + $0x150] sm:$0xff] %v720_v0 }
 0x162   : > { %v808_v1 = vpop.f32.mrf.mxu2 }
 0x163   : > { %v897_v2 = vpop.f32.mrf.mxu3  ;;  %v633_v3 = vpop.f32.mrf.mxu0 }
 0x164   : > { %v898_v4 = vadd.f32 %v897_v2, %v808_v1  ;;  %v722_v5 = vpop.f32.mrf.mxu1 }
 0x165   : > { %v723_v6 = vadd.f32 %v722_v5, %v633_v3 }
 0x166   : > { %968 = vst [vmem:[%s1881_s4 + $0x158] sm:$0xff] %v898_v4 }
 0x167   : > { %969 = vst [vmem:[%s1881_s4 + $0x160] sm:$0xff] %v723_v6 }
 0x16a   : > { %v811_v7 = vpop.f32.mrf.mxu2 }
 0x16b   : > { %v900_v8 = vpop.f32.mrf.mxu3  ;;  %v635_v9 = vpop.f32.mrf.mxu0 }
 0x16c   : > { %v901_v10 = vadd.f32 %v900_v8, %v811_v7  ;;  %v724_v11 = vpop.f32.mrf.mxu1 }
 0x16d   : > { %v725_v12 = vadd.f32 %v724_v11, %v635_v9 }
 0x16e   : > { %970 = vst [vmem:[%s1881_s4 + $0x168] sm:$0xff] %v901_v10 }
 0x16f   : > { %971 = vst [vmem:[%s1881_s4 + $0x170] sm:$0xff] %v725_v12 }
 0x172   : > { %v813_v13 = vpop.f32.mrf.mxu2 }
 0x173   : > { %v902_v14 = vpop.f32.mrf.mxu3  ;;  %v638_v15 = vpop.f32.mrf.mxu0 }
 0x174   : > { %v903_v16 = vadd.f32 %v902_v14, %v813_v13  ;;  %v727_v17 = vpop.f32.mrf.mxu1 }
 0x175   : > { %v728_v18 = vadd.f32 %v727_v17, %v638_v15 }
 0x176   : > { %972 = vst [vmem:[%s1881_s4 + $0x178] sm:$0xff] %v903_v16 }
 0x177   : > { %973 = vst [vmem:[%s1881_s4 + $0x180] sm:$0xff] %v728_v18 }
 0x17a   : > { %v816_v19 = vpop.f32.mrf.mxu2 }
 0x17b   : > { %v905_v20 = vpop.f32.mrf.mxu3  ;;  %v640_v21 = vpop.f32.mrf.mxu0 }
 0x17c   : > { %v906_v22 = vadd.f32 %v905_v20, %v816_v19  ;;  %v729_v23 = vpop.f32.mrf.mxu1 }
 0x17d   : > { %v730_v24 = vadd.f32 %v729_v23, %v640_v21 }
 0x17e   : > { %974 = vst [vmem:[%s1881_s4 + $0x188] sm:$0xff] %v906_v22 }
 0x17f   : > { %975 = vst [vmem:[%s1881_s4 + $0x190] sm:$0xff] %v730_v24 }
 0x182   : > { %v818_v25 = vpop.f32.mrf.mxu2 }
 0x183   : > { %v907_v26 = vpop.f32.mrf.mxu3  ;;  %v643_v27 = vpop.f32.mrf.mxu0 }
 0x184   : > { %v908_v28 = vadd.f32 %v907_v26, %v818_v25  ;;  %v732_v29 = vpop.f32.mrf.mxu1 }
 0x185   : > { %v733_v30 = vadd.f32 %v732_v29, %v643_v27 }
 0x186   : > { %976 = vst [vmem:[%s1881_s4 + $0x198] sm:$0xff] %v908_v28 }
 0x187   : > { %977 = vst [vmem:[%s1881_s4 + $0x1a0] sm:$0xff] %v733_v30 }
 0x18a   : > { %v821_v31 = vpop.f32.mrf.mxu2 }
 0x18b   : > { %v910_v32 = vpop.f32.mrf.mxu3  ;;  %v645_v33 = vpop.f32.mrf.mxu0 }
 0x18c   : > { %v911_v34 = vadd.f32 %v910_v32, %v821_v31  ;;  %v734_v35 = vpop.f32.mrf.mxu1 }
 0x18d   : > { %v735_v36 = vadd.f32 %v734_v35, %v645_v33 }
 0x18e   : > { %978 = vst [vmem:[%s1881_s4 + $0x1a8] sm:$0xff] %v911_v34 }
 0x18f   : > { %979 = vst [vmem:[%s1881_s4 + $0x1b0] sm:$0xff] %v735_v36 }
 0x192   : > { %v823_v37 = vpop.f32.mrf.mxu2 }
 0x193   : > { %v912_v38 = vpop.f32.mrf.mxu3  ;;  %v648_v39 = vpop.f32.mrf.mxu0 }
 0x194   : > { %v913_v40 = vadd.f32 %v912_v38, %v823_v37  ;;  %v737_v41 = vpop.f32.mrf.mxu1 }
 0x195   : > { %v738_v42 = vadd.f32 %v737_v41, %v648_v39 }
 0x196   : > { %980 = vst [vmem:[%s1881_s4 + $0x1b8] sm:$0xff] %v913_v40 }
 0x197   : > { %981 = vst [vmem:[%s1881_s4 + $0x1c0] sm:$0xff] %v738_v42 }
 0x19a   : > { %v826_v43 = vpop.f32.mrf.mxu2 }
 0x19b   : > { %v915_v44 = vpop.f32.mrf.mxu3  ;;  %v650_v45 = vpop.f32.mrf.mxu0 }
 0x19c   : > { %v916_v46 = vadd.f32 %v915_v44, %v826_v43  ;;  %v739_v47 = vpop.f32.mrf.mxu1 }
 0x19d   : > { %v740_v48 = vadd.f32 %v739_v47, %v650_v45 }
 0x19e   : > { %982 = vst [vmem:[%s1881_s4 + $0x1c8] sm:$0xff] %v916_v46 }
 0x19f   : > { %983 = vst [vmem:[%s1881_s4 + $0x1d0] sm:$0xff] %v740_v48 }
 0x1a2   : > { %v828_v49 = vpop.f32.mrf.mxu2 }
 0x1a3   : > { %v917_v50 = vpop.f32.mrf.mxu3  ;;  %v653_v51 = vpop.f32.mrf.mxu0 }
 0x1a4   : > { %v918_v52 = vadd.f32 %v917_v50, %v828_v49  ;;  %v742_v53 = vpop.f32.mrf.mxu1 }
 0x1a5   : > { %v743_v54 = vadd.f32 %v742_v53, %v653_v51 }
 0x1a6   : > { %984 = vst [vmem:[%s1881_s4 + $0x1d8] sm:$0xff] %v918_v52 }
 0x1a7   : > { %985 = vst [vmem:[%s1881_s4 + $0x1e0] sm:$0xff] %v743_v54 }
 0x1aa   : > { %v831_v55 = vpop.f32.mrf.mxu2 }
 0x1ab   : > { %v920_v56 = vpop.f32.mrf.mxu3  ;;  %v655_v57 = vpop.f32.mrf.mxu0 }
 0x1ac   : > { %v921_v58 = vadd.f32 %v920_v56, %v831_v55  ;;  %v744_v59 = vpop.f32.mrf.mxu1 }
 0x1ad   : > { %v745_v60 = vadd.f32 %v744_v59, %v655_v57 }
 0x1ae   : > { %986 = vst [vmem:[%s1881_s4 + $0x1e8] sm:$0xff] %v921_v58 }
 0x1af   : > { %987 = vst [vmem:[%s1881_s4 + $0x1f0] sm:$0xff] %v745_v60 }
 0x1b2   : > { %v833_v61 = vpop.f32.mrf.mxu2 }
 0x1b3   : > { %v922_v62 = vpop.f32.mrf.mxu3 }
 0x1b4   : > { %v923_v63 = vadd.f32 %v922_v62, %v833_v61 }
 0x1b6   : > { %988 = vst [vmem:[%s1881_s4 + $0x1f8] sm:$0xff] %v923_v63 }
 0x1b7   : > { %1519 = shalt.err (!%p1516_p5)
}
 0x1b8   : > { %s1572_s29 = smov 256   ;;  %s1573_s30 = smov 16  }
 0x1b9   : > { %1435 = dma.vmem_to_hbm [thread:$0]  (%p1629_p4), %s1006_s15, 8192, %s1008_s16, %s990_s12, %s1572_s29, %s1572_s29, %s1573_s30  }
 0x1ba PF: > { %p1441_p6 = scmp.ge.s32.totalorder %s1570_s14, 2  ;;  %s1022_s23 = sand.u32 1, %s1550_s9  }
 0x1bb   : > { %s1023_s3 = scalar_lea.sflag [#allocation3], %s1022_s23 }
 0x1bc   : > { %p1438_p7 = pnand %p1441_p6, %p1636_p8 }
 0x1be   : > { %p1439_p9 = pneg %p1438_p7 }
 0x1c0   : > { %1545 = dma.done.wait (%p1439_p9), %s1023_s3, 8192  }
 0x1c1   : > { %1547 = vsyncadd (%p1439_p9), %s1023_s3, 4294959104  ;;  %s15_s14 = sadd.s32 1, %s1570_s14   ;;  %s2019_s9 = smov %s1554_s10 }
 0x1c2   : > { %p12_p10 = scmp.ge.s32.totalorder %s15_s14, 4   ;;  %s2020_s10 = smov %s1558_s11 }
 0x1c3   : > { %s2021_s11 = smov %s1642_s22  ;;  %s2022_s12 = smov %s1566_s13 }
 0x1c4   : > { %s2023_s13 = smov %s2025_s17  ;;  %14 = sbr.rel (!%p12_p10) target bundleno = 4 (0x4), region = 66 }
 0x1c9   :  { %1029 = vsyncpa [#allocation3], 1 }
 0x1ca   :  { %1031 = vsyncpa [#allocation3 + $0x1], 1 }

</bundles_post_ra>
